<compile_context>
chip_gen: v6e
topology: v6e:2x2x1
jax: 0.10.0
libtpu: 0.0.40
codegen_flags: <defaults>
</compile_context>

<pallas_src>
import functools

import numpy as np
import jax
import jax.numpy as jnp
from jax.experimental import pallas as pl
from jax.experimental.pallas import tpu as pltpu

KS = 7                       # CBAM spatial-attention kernel size
_DENSE_CONV_MAX_HW = 1024    # dense conv-matrix path only below this (see TODO above)
_CONV_MAT_CACHE = {}


def _pab_kernel(x_ref, w1_ref, w2_ref, m_ref, cha_ref, spa_ref, *, block_b):
    """One block of `block_b` batch elements per grid step.

    x_ref   : VMEM (block_b, C, H*W)        input block, native NCHW (HW on lanes)
    w1_ref  : VMEM (C, C//16)               channel-MLP fc1 (f32, single-buffered)
    w2_ref  : VMEM (C//16, C)               channel-MLP fc2 (f32, single-buffered)
    m_ref   : VMEM (2*H*W, H*W) bf16        dense 7x7 'same'-conv matrix [avg rows; max rows]
    cha_ref : VMEM (1, 1, block_b*C)        channel-attention output (lane-dense tile)
    spa_ref : VMEM (1, 1, block_b*H*W)      spatial-attention output (lane-dense tile)
    """
    C = x_ref.shape[1]
    HW = x_ref.shape[2]

    x = x_ref[...].astype(jnp.float32)               # (block_b, C, HW)
    x2 = x.reshape(block_b * C, HW)                  # free leading-dim collapse

    # ---------------- channel attention ----------------
    avg = jnp.mean(x, axis=2)                        # (block_b, C)  AdaptiveAvgPool2d(1)
    mx = jnp.max(x, axis=2)                          # (block_b, C)  AdaptiveMaxPool2d(1)
    pooled = jnp.concatenate([avg, mx], axis=0)      # (2*block_b, C): one fused MLP pass
    h = jnp.maximum(
        jnp.dot(pooled, w1_ref[...], preferred_element_type=jnp.float32), 0.0)
    z = jnp.dot(h, w2_ref[...], preferred_element_type=jnp.float32)
    cha = jax.nn.sigmoid(z[:block_b] + z[block_b:])  # mlp(avg) + mlp(max)
    cha_ref[...] = cha.reshape(cha_ref.shape).astype(cha_ref.dtype)

    # ---------------- spatial attention ----------------
    # Mean over channels on the MXU: sel (block_b, block_b*C) @ x2 (block_b*C, HW).
    rows = jax.lax.broadcasted_iota(jnp.int32, (block_b, block_b * C), 0)
    cols = jax.lax.broadcasted_iota(jnp.int32, (block_b, block_b * C), 1)
    in_grp = (cols >= rows * C) & (cols < rows * C + C)
    sel = jnp.where(in_grp, jnp.float32(1.0 / C), jnp.float32(0.0))
    s_avg = jnp.dot(sel, x2, preferred_element_type=jnp.float32)    # (block_b, HW)
    s_max = jnp.max(x, axis=1)                                      # (block_b, HW)
    # Whole 7x7 'same' conv (both stacked channels) as one bf16 MXU matmul, f32 acc.
    s_cat = jnp.concatenate([s_avg, s_max], axis=1).astype(m_ref.dtype)  # (block_b, 2*HW)
    logits = jnp.dot(s_cat, m_ref[...], preferred_element_type=jnp.float32)
    spa = jax.nn.sigmoid(logits)                                    # (block_b, HW)
    spa_ref[...] = spa.reshape(spa_ref.shape).astype(spa_ref.dtype)


def _conv_matrix(conv_w, H, W):
    """Host-built (numpy, cached) dense bf16 matrix M of shape (2*HW, HW) such that

        conv_logits = [flat(mean_c(x)) | flat(max_c(x))] @ M

    reproduces Conv2d(2, 1, kernel_size=7, padding=3, bias=False) with OIHW weight
    `conv_w` (1, 2, 7, 7); input channel 0 multiplies the mean map, channel 1 the max
    map (matching torch.cat([mean_c, max_c], dim=1))."""
    w = np.asarray(conv_w, dtype=np.float32).reshape(2, KS, KS)
    key = (H, W, w.tobytes())
    hit = _CONV_MAT_CACHE.get(key)
    if hit is not None:
        return hit
    HW = H * W
    pad = KS // 2
    idx = np.arange(HW)
    qy, qx = idx // W, idx % W                       # pixel coords
    dy = qy[:, None] - qy[None, :] + pad             # (HW source, HW output)
    dx = qx[:, None] - qx[None, :] + pad
    valid = (dy >= 0) & (dy < KS) & (dx >= 0) & (dx < KS)
    dyc = np.clip(dy, 0, KS - 1)
    dxc = np.clip(dx, 0, KS - 1)
    m_avg = np.where(valid, w[0][dyc, dxc], 0.0)
    m_max = np.where(valid, w[1][dyc, dxc], 0.0)
    m = jnp.asarray(np.concatenate([m_avg, m_max], axis=0), dtype=jnp.bfloat16)
    _CONV_MAT_CACHE[key] = m
    return m


def _choose_block_b(B, C, HW, const_bytes):
    """Largest batch block that (a) keeps non-constant VMEM traffic under ~12 MiB
    (below v5e's 16 MiB default scoped limit, comfortable on v6e/v7x), (b) divides B,
    and (c) leaves >= 2 grid steps whenever B >= 2 so the 'parallel' batch axis can be
    split across v7x's two TensorCores (measured-neutral on v5e/v6e)."""
    per_sample = 2 * C * HW * 4 + 2 * 2 * (C + HW) * 4   # dbuf input + dbuf outputs
    budget = (12 << 20) - const_bytes
    cap = max(1, budget // per_sample) if budget > per_sample else 1
    cap = min(cap, 32)     # per-step overhead (~0.35 us) is amortized well before 32
    divisors = [d for d in range(1, B + 1) if B % d == 0 and d <= cap]
    if not divisors:
        return 1
    feed_two = [d for d in divisors if B // d >= 2]
    return max(feed_two) if feed_two else max(divisors)


def pab_forward(x_nchw, fc1_w, fc2_w, conv_w):
    """x_nchw: (B, C, H, W) float32.  Weights in native PyTorch shapes:
         fc1_w  (C//16, C, 1, 1)   Conv2d(C, C//16, 1, bias=False).weight
         fc2_w  (C, C//16, 1, 1)   Conv2d(C//16, C, 1, bias=False).weight
         conv_w (1, 2, 7, 7)       Conv2d(2, 1, 7, padding=3, bias=False).weight
    Returns (spa (B,1,H,W), cha (B,C,1,1)), i.e. the CBAM attention matrices."""
    B, C, H, W = x_nchw.shape
    HW = H * W
    hidden = fc1_w.shape[0]
    assert fc1_w.shape == (hidden, C, 1, 1) and fc2_w.shape == (C, hidden, 1, 1)
    assert conv_w.shape == (1, 2, KS, KS)
    assert HW <= _DENSE_CONV_MAX_HW, (
        "dense conv-matrix path only; see TODO(synk) banded formulation for larger maps")

    # 1x1-conv weights as plain matmul operands (kept f32: tiny, preserves cha accuracy).
    w1 = jnp.asarray(fc1_w, jnp.float32).reshape(hidden, C).T     # (C, hidden)
    w2 = jnp.asarray(fc2_w, jnp.float32).reshape(C, hidden).T     # (hidden, C)
    m_conv = _conv_matrix(conv_w, H, W)                           # (2*HW, HW) bf16

    # Native NCHW layout, spatial dims flattened onto the lane axis (free reshape).
    x_flat = x_nchw.reshape(B, C, HW)

    const_bytes = int(m_conv.size) * 2 + int(w1.size + w2.size) * 4
    block_b = _choose_block_b(B, C, HW, const_bytes)
    num_blocks = B // block_b

    # Explicit scoped-VMEM limit only when we would exceed v5e's 16 MiB default.
    need_bytes = (const_bytes
                  + 2 * block_b * C * HW * 4
                  + 2 * 2 * block_b * (C + HW) * 4)
    vmem_limit = (int(min(64 << 20, need_bytes + (4 << 20)))
                  if need_bytes > (14 << 20) else None)

    kernel = functools.partial(_pab_kernel, block_b=block_b)
    const_mode = pl.Buffered(buffer_count=1)   # constants: fetch once, single-buffer

    cha, spa = pl.pallas_call(
        kernel,
        out_shape=(
            jax.ShapeDtypeStruct((num_blocks, 1, block_b * C), jnp.float32),
            jax.ShapeDtypeStruct((num_blocks, 1, block_b * HW), jnp.float32),
        ),
        grid_spec=pltpu.PrefetchScalarGridSpec(
            num_scalar_prefetch=0,
            grid=(num_blocks,),
            in_specs=[
                pl.BlockSpec((block_b, C, HW), lambda b: (b, 0, 0)),
                pl.BlockSpec((C, hidden), lambda b: (0, 0), pipeline_mode=const_mode),
                pl.BlockSpec((hidden, C), lambda b: (0, 0), pipeline_mode=const_mode),
                pl.BlockSpec((2 * HW, HW), lambda b: (0, 0), pipeline_mode=const_mode),
            ],
            out_specs=[
                pl.BlockSpec((1, 1, block_b * C), lambda b: (b, 0, 0)),
                pl.BlockSpec((1, 1, block_b * HW), lambda b: (b, 0, 0)),
            ],
        ),
        compiler_params=pltpu.CompilerParams(
            dimension_semantics=("parallel",),        # batch axis -> both v7x TCs
            vmem_limit_bytes=vmem_limit),
    )(x_flat, w1, w2, m_conv)

    # Same contiguous layout -> free reshapes back to torch output shapes.
    spa_out = spa.reshape(B, 1, H, W)
    cha_out = cha.reshape(B, C, 1, 1)
    return spa_out, cha_out


def _reference(x, fc1_w, fc2_w, conv_w):
    """Pure-JAX reference of the same math (for sanity checking)."""
    B, C, H, W = x.shape
    hidden = fc1_w.shape[0]
    w1 = fc1_w.reshape(hidden, C).T
    w2 = fc2_w.reshape(C, hidden).T
    # channel attention
    avg = jnp.mean(x, axis=(2, 3))
    mx = jnp.max(x, axis=(2, 3))
    mlp = lambda v: jnp.maximum(v @ w1, 0.0) @ w2
    cha = jax.nn.sigmoid(mlp(avg) + mlp(mx)).reshape(B, C, 1, 1)
    # spatial attention
    s_avg = jnp.mean(x, axis=1)
    s_max = jnp.max(x, axis=1)
    feat = jnp.stack([s_avg, s_max], axis=1)              # (B, 2, H, W)
    conv = jax.lax.conv_general_dilated(
        feat, conv_w, window_strides=(1, 1), padding=((3, 3), (3, 3)),
        dimension_numbers=("NCHW", "OIHW", "NCHW"))
    spa = jax.nn.sigmoid(conv)                            # (B, 1, H, W)
    return spa, cha


if __name__ == "__main__":
    # planes=8 -> CBAM channels C = planes*4 = 32, reduction 16 -> hidden = 2
    B, planes, H, W = 2, 8, 16, 16
    C = planes * 4
    hidden = max(C // 16, 1)

    key = jax.random.PRNGKey(0)
    kx, k1, k2, k3 = jax.random.split(key, 4)
    x = jax.random.normal(kx, (B, C, H, W), dtype=jnp.float32)
    # Parameters in native PyTorch layouts.
    fc1_w = 0.1 * jax.random.normal(k1, (hidden, C, 1, 1), dtype=jnp.float32)
    fc2_w = 0.1 * jax.random.normal(k2, (C, hidden, 1, 1), dtype=jnp.float32)
    conv_w = 0.05 * jax.random.normal(k3, (1, 2, KS, KS), dtype=jnp.float32)

    spa, cha = pab_forward(x, fc1_w, fc2_w, conv_w)
    jax.block_until_ready((spa, cha))

    spa_ref, cha_ref = _reference(x, fc1_w, fc2_w, conv_w)
    assert spa.shape == (B, 1, H, W) and cha.shape == (B, C, 1, 1)
    # Channel path is f32 end-to-end.
    assert jnp.allclose(cha, cha_ref, atol=1e-5, rtol=1e-5), float(
        jnp.max(jnp.abs(cha - cha_ref)))
    # Spatial path runs the 7x7 conv through a bf16 matrix (f32 accumulation).
    assert jnp.allclose(spa, spa_ref, atol=2e-2), float(
        jnp.max(jnp.abs(spa - spa_ref)))

    print("KERNEL_OK")
</pallas_src>

<mosaic_0001>
module attributes {stable_mosaic.version = 11 : i64} {
  func.func @_pab_kernel(%arg0: i32, %arg1: memref<1x32x256xf32, #tpu.memory_space<vmem>>, %arg2: memref<32x2xf32, #tpu.memory_space<vmem>>, %arg3: memref<2x32xf32, #tpu.memory_space<vmem>>, %arg4: memref<512x256xbf16, #tpu.memory_space<vmem>>, %arg5: memref<1x1x32xf32, #tpu.memory_space<vmem>>, %arg6: memref<1x1x256xf32, #tpu.memory_space<vmem>>) attributes {dimension_semantics = [#tpu.dimension_semantics<parallel>], iteration_bounds = array<i64: 2>, scalar_prefetch = 0 : i64, scratch_operands = 0 : i64, tpu.core_type = #tpu.core_type<tc>, window_params = [{transform_indices = @transform_0, window_bounds = array<i64: 1, 32, 256>}, {pipeline_mode = #tpu.pipeline_mode<synchronous>, transform_indices = @transform_1, window_bounds = array<i64: 32, 2>}, {pipeline_mode = #tpu.pipeline_mode<synchronous>, transform_indices = @transform_2, window_bounds = array<i64: 2, 32>}, {pipeline_mode = #tpu.pipeline_mode<synchronous>, transform_indices = @transform_3, window_bounds = array<i64: 512, 256>}, {transform_indices = @transform_4, window_bounds = array<i64: 1, 1, 32>}, {transform_indices = @transform_5, window_bounds = array<i64: 1, 1, 256>}]} {
    %c0 = arith.constant 0 : index
    %c0_0 = arith.constant 0 : index
    %c0_1 = arith.constant 0 : index
    %0 = vector.load %arg1[%c0, %c0_0, %c0_1] : memref<1x32x256xf32, #tpu.memory_space<vmem>>, vector<1x32x256xf32>
    %1 = vector.shape_cast %0 : vector<1x32x256xf32> to vector<32x256xf32>
    %cst = arith.constant dense<0.000000e+00> : vector<1x32xf32>
    %2 = vector.multi_reduction <add>, %0, %cst [2] : vector<1x32x256xf32> to vector<1x32xf32>
    %cst_2 = arith.constant 2.560000e+02 : f32
    %3 = vector.broadcast %cst_2 : f32 to vector<1x32xf32>
    %4 = arith.divf %2, %3 : vector<1x32xf32>
    %cst_3 = arith.constant dense<0xFF800000> : vector<1x32xf32>
    %5 = vector.multi_reduction <maximumf>, %0, %cst_3 [2] : vector<1x32x256xf32> to vector<1x32xf32>
    %6 = tpu.concatenate %4, %5 in 0 : vector<1x32xf32>, vector<1x32xf32> -> vector<2x32xf32>
    %c0_4 = arith.constant 0 : index
    %c0_5 = arith.constant 0 : index
    %7 = vector.load %arg2[%c0_4, %c0_5] : memref<32x2xf32, #tpu.memory_space<vmem>>, vector<32x2xf32>
    %cst_6 = arith.constant dense<0.000000e+00> : vector<2x2xf32>
    %8 = tpu.matmul %6, %7, %cst_6 {dimension_numbers = #tpu.dot_dimension_numbers<[1], [0], [0], [1], [0, 0, 1, 1], [], []>} : vector<2x32xf32>, vector<32x2xf32>, vector<2x2xf32> -> vector<2x2xf32>
    %cst_7 = arith.constant 0.000000e+00 : f32
    %9 = vector.broadcast %cst_7 : f32 to vector<2x2xf32>
    %10 = arith.maximumf %8, %9 : vector<2x2xf32>
    %c0_8 = arith.constant 0 : index
    %c0_9 = arith.constant 0 : index
    %11 = vector.load %arg3[%c0_8, %c0_9] : memref<2x32xf32, #tpu.memory_space<vmem>>, vector<2x32xf32>
    %cst_10 = arith.constant dense<0.000000e+00> : vector<2x32xf32>
    %12 = tpu.matmul %10, %11, %cst_10 {dimension_numbers = #tpu.dot_dimension_numbers<[1], [0], [0], [1], [0, 0, 1, 1], [], []>} : vector<2x2xf32>, vector<2x32xf32>, vector<2x32xf32> -> vector<2x32xf32>
    %13 = vector.extract_strided_slice %12 {offsets = [0, 0], sizes = [1, 32], strides = [1, 1]} : vector<2x32xf32> to vector<1x32xf32>
    %14 = vector.extract_strided_slice %12 {offsets = [1, 0], sizes = [1, 32], strides = [1, 1]} : vector<2x32xf32> to vector<1x32xf32>
    %15 = arith.addf %13, %14 : vector<1x32xf32>
    %16 = arith.negf %15 : vector<1x32xf32>
    %17 = math.exp %16 : vector<1x32xf32>
    %cst_11 = arith.constant 1.000000e+00 : f32
    %18 = vector.broadcast %cst_11 : f32 to vector<1x32xf32>
    %19 = arith.addf %18, %17 : vector<1x32xf32>
    %20 = arith.divf %18, %19 : vector<1x32xf32>
    %21 = vector.shape_cast %20 : vector<1x32xf32> to vector<1x1x32xf32>
    %c0_12 = arith.constant 0 : index
    %c0_13 = arith.constant 0 : index
    %c0_14 = arith.constant 0 : index
    %22 = vector.load %arg5[%c0_12, %c0_13, %c0_14] : memref<1x1x32xf32, #tpu.memory_space<vmem>>, vector<1x1x32xf32>
    tpu.vector_store %arg5[%c0_12, %c0_13, %c0_14], %21 {strides = array<i32>} : memref<1x1x32xf32, #tpu.memory_space<vmem>>, vector<1x1x32xf32>,
    %23 = tpu.iota {dimensions = array<i32: 0>} : vector<1x32xi32>
    %24 = tpu.iota {dimensions = array<i32: 1>} : vector<1x32xi32>
    %c32_i32 = arith.constant 32 : i32
    %25 = vector.broadcast %c32_i32 : i32 to vector<1x32xi32>
    %26 = arith.muli %23, %25 : vector<1x32xi32>
    %27 = arith.cmpi sge, %24, %26 : vector<1x32xi32>
    %c32_i32_15 = arith.constant 32 : i32
    %28 = vector.broadcast %c32_i32_15 : i32 to vector<1x32xi32>
    %29 = arith.muli %23, %28 : vector<1x32xi32>
    %c32_i32_16 = arith.constant 32 : i32
    %30 = vector.broadcast %c32_i32_16 : i32 to vector<1x32xi32>
    %31 = arith.addi %29, %30 : vector<1x32xi32>
    %32 = arith.cmpi slt, %24, %31 : vector<1x32xi32>
    %33 = arith.andi %27, %32 : vector<1x32xi1>
    %cst_17 = arith.constant 3.125000e-02 : f32
    %cst_18 = arith.constant 0.000000e+00 : f32
    %34 = vector.broadcast %cst_17 : f32 to vector<1x32xf32>
    %35 = vector.broadcast %cst_18 : f32 to vector<1x32xf32>
    %36 = arith.select %33, %34, %35 : vector<1x32xi1>, vector<1x32xf32>
    %cst_19 = arith.constant dense<0.000000e+00> : vector<1x256xf32>
    %37 = tpu.matmul %36, %1, %cst_19 {dimension_numbers = #tpu.dot_dimension_numbers<[1], [0], [0], [1], [0, 0, 1, 1], [], []>} : vector<1x32xf32>, vector<32x256xf32>, vector<1x256xf32> -> vector<1x256xf32>
    %cst_20 = arith.constant dense<0xFF800000> : vector<1x256xf32>
    %38 = vector.multi_reduction <maximumf>, %0, %cst_20 [1] : vector<1x32x256xf32> to vector<1x256xf32>
    %39 = tpu.concatenate %37, %38 in 1 : vector<1x256xf32>, vector<1x256xf32> -> vector<1x512xf32>
    %40 = arith.truncf %39 : vector<1x512xf32> to vector<1x512xbf16>
    %c0_21 = arith.constant 0 : index
    %c0_22 = arith.constant 0 : index
    %41 = vector.load %arg4[%c0_21, %c0_22] : memref<512x256xbf16, #tpu.memory_space<vmem>>, vector<512x256xbf16>
    %cst_23 = arith.constant dense<0.000000e+00> : vector<1x256xf32>
    %42 = tpu.matmul %40, %41, %cst_23 {dimension_numbers = #tpu.dot_dimension_numbers<[1], [0], [0], [1], [0, 0, 1, 1], [], []>} : vector<1x512xbf16>, vector<512x256xbf16>, vector<1x256xf32> -> vector<1x256xf32>
    %43 = arith.negf %42 : vector<1x256xf32>
    %44 = math.exp %43 : vector<1x256xf32>
    %cst_24 = arith.constant 1.000000e+00 : f32
    %45 = vector.broadcast %cst_24 : f32 to vector<1x256xf32>
    %46 = arith.addf %45, %44 : vector<1x256xf32>
    %47 = arith.divf %45, %46 : vector<1x256xf32>
    %48 = vector.shape_cast %47 : vector<1x256xf32> to vector<1x1x256xf32>
    %c0_25 = arith.constant 0 : index
    %c0_26 = arith.constant 0 : index
    %c0_27 = arith.constant 0 : index
    %49 = vector.load %arg6[%c0_25, %c0_26, %c0_27] : memref<1x1x256xf32, #tpu.memory_space<vmem>>, vector<1x1x256xf32>
    tpu.vector_store %arg6[%c0_25, %c0_26, %c0_27], %48 {strides = array<i32>} : memref<1x1x256xf32, #tpu.memory_space<vmem>>, vector<1x1x256xf32>,
    return
  }
  func.func @transform_0(%arg0: i32) -> (i32, i32, i32) {
    %c0_i32 = arith.constant 0 : i32
    %c0_i32_0 = arith.constant 0 : i32
    %c0_i32_1 = arith.constant 0 : i32
    return %arg0, %c0_i32, %c0_i32_0 : i32, i32, i32
  }
  func.func @transform_1(%arg0: i32) -> (i32, i32) {
    %c0_i32 = arith.constant 0 : i32
    %c0_i32_0 = arith.constant 0 : i32
    %c0_i32_1 = arith.constant 0 : i32
    return %c0_i32, %c0_i32_0 : i32, i32
  }
  func.func @transform_2(%arg0: i32) -> (i32, i32) {
    %c0_i32 = arith.constant 0 : i32
    %c0_i32_0 = arith.constant 0 : i32
    %c0_i32_1 = arith.constant 0 : i32
    return %c0_i32, %c0_i32_0 : i32, i32
  }
  func.func @transform_3(%arg0: i32) -> (i32, i32) {
    %c0_i32 = arith.constant 0 : i32
    %c0_i32_0 = arith.constant 0 : i32
    %c0_i32_1 = arith.constant 0 : i32
    return %c0_i32, %c0_i32_0 : i32, i32
  }
  func.func @transform_4(%arg0: i32) -> (i32, i32, i32) {
    %c0_i32 = arith.constant 0 : i32
    %c0_i32_0 = arith.constant 0 : i32
    %c0_i32_1 = arith.constant 0 : i32
    return %arg0, %c0_i32, %c0_i32_0 : i32, i32, i32
  }
  func.func @transform_5(%arg0: i32) -> (i32, i32, i32) {
    %c0_i32 = arith.constant 0 : i32
    %c0_i32_0 = arith.constant 0 : i32
    %c0_i32_1 = arith.constant 0 : i32
    return %arg0, %c0_i32, %c0_i32_0 : i32, i32, i32
  }
}

</mosaic_0001>

<bundles_post_ra>
// kernel: tpu_custom_call.1
= control target key start
LH: loop header
LB: loop body
LE: loop exit
PB: predicated region body
PF: predicated region fallthrough
CT: control target
= control target key end

     0   :  { %11 = vsyncpa [#allocation3], 0  ;;  %s2040_s0 = inlined_call_operand.hbm [shape: f32[2,32,256], index: 0, kind: input, shape index: {}]   ;;  %s2041_s1 = inlined_call_operand.vmem [shape: f32[32,2], index: 1, kind: input, shape index: {}]   ;;  %s2042_s2 = inlined_call_operand.vmem [shape: f32[2,32], index: 2, kind: input, shape index: {}]   ;;  %s2043_s3 = inlined_call_operand.hbm [shape: bf16[512,256], index: 3, kind: input, shape index: {}]   ;;  %s2044_s4 = inlined_call_operand.hbm [shape: f32[2,1,32], index: 4, kind: output, shape index: {0}]   ;;  %s2045_s5 = inlined_call_operand.hbm [shape: f32[2,1,256], index: 5, kind: output, shape index: {1}]  }
   0x1   :  { %13 = vsyncpa [#allocation3 + $0x1], 0 }
   0x2   :  { %14 = vsyncpa [#allocation6], 0 }
   0x3   :  { %15 = vsyncpa [#allocation4], 0 }
   0x4   :  { %17 = vsyncpa [#allocation4 + $0x1], 0 }
   0x5   :  { %18 = vsyncpa [#allocation9], 0 }
   0x6   :  { %20 = vsyncpa [#allocation9 + $0x1], 0  ;;  %s1763_s18 = smov 0   ;;  %s1765_s19 = smov 0  }
   0x7   :  { %s1767_s20 = smov 0   ;;  %s1769_s21 = smov 0  }
   0x8 LB: > { %s1784_s22 = sadd.s32 4294967295, %s1720_s21   ;;  %s1278_s23 = sadd.s32 4294967294, %s1720_s21   ;;  %s1720_s21 = sphi %s1769_s21, %s2067_s21   ;;  %s1716_s20 = sphi %s1767_s20, %s2066_s20   ;;  %s1712_s19 = sphi %s1765_s19, %s2065_s19   ;;  %s1708_s18 = sphi %s1763_s18, %s2064_s18  }
   0x9   : > { %p46_p0 = scmp.ne.s32.totalorder %s1712_s19, %s1708_s18  ;;  %p2046_p1 = scmp.eq.s32.totalorder %s1784_s22, 0 }
   0xa   : > { %p139_p3 = scmp.eq.s32.totalorder %s1278_s23, 1  ;;  %p1279_p5 = scmp.ge.s32.totalorder %s1720_s21, 1 }
   0xb   : > { %p1793_p4 = por %p2046_p1, %p46_p0  ;;  %p172_p7 = scmp.lt.s32.totalorder %s1720_s21, 3 }
   0xc   : > { %p1798_p6 = por %p139_p3, %p46_p0  ;;  %s1722_s27 = smov [#allocation5]  }
   0xd   : > { %s2050_s24 = scalar_select %p1793_p4, 1, 0 }
   0xe   : > { %s2051_s25 = scalar_select %p1798_p6, 1, 0 }
   0xf   : > { %p1803_p8 = pnand %p1279_p5, %p172_p7  ;;  %s190_s28 = sshll.u32 %s1722_s27, 4  ;;  %s191_s28 = int_to_ptr.vmem [resolvable:$true] %s190_s28 }
  0x10   : > { %s1817_s30 = sadd.s32 1, %s1720_s21   ;;  %s33_s6 = sadd.s32 1, %s1716_s20 }
  0x11   : > { %s2052_s26 = scalar_select %p1803_p8, 1, 0 }
  0x12   : > { %p1401_p9 = pneg %p1803_p8  ;;  %s30_s7 = ssub.s32 %s1720_s21, %s1817_s30 }
  0x13   : > { %s1579_s8 = scalar_lea.vmem %s191_s28, 8192  ;;  %p1587_p5 = scmp.lt.s32.totalorder %s191_s28, %s191_s28 }
  0x14   : > { %p1812_p11 = pnand %p1401_p9, %p2046_p1  ;;  %p1580_p13 = scmp.ne.s32.totalorder %s191_s28, %s1579_s8 }
  0x15   : > { %p1588_p7 = scmp.lt.s32.totalorder %s1579_s8, %s1579_s8 }
  0x16   : > { %p1570_p12 = pneg %p1812_p11 }
  0x17   : > { %p1589_p10 = por %p1588_p7, %p1587_p5 }
  0x18   : > { %p1582_p0 = pnand %p1580_p13, %p1570_p12 }
  0x1a   : > { %p1583_p3 = pneg %p1582_p0 }
  0x1c   : > { %p1590_p2 = pnand %p1589_p10, %p1583_p3 }
  0x1e   : > { %1593 = shalt.err (!%p1590_p2)
}
  0x1f   : > { %s1723_s9 = smov 128   ;;  %s1724_s10 = smov 8  }
  0x20   : > { %1404 = dma.hbm_to_vmem [thread:$0]  (!%p1812_p11), %s2043_s3, 8192, %s191_s28, [#allocation6], %s1723_s9, %s1723_s9, %s1724_s10  }
  0x21   : > { %p31_p9 = scmp.eq.s32.totalorder %s30_s7, 0  ;;  %p40_p12 = scmp.ne.s32.totalorder %s1716_s20, %s1712_s19 }
  0x22   : > { %p41_p10 = scmp.eq.s32.totalorder %s1720_s21, 0  ;;  %p1417_p2 = scmp.lt.s32.totalorder %s1720_s21, 2 }
  0x23   : > { %s1834_s13 = scalar_select %p31_p9, %s1716_s20, %s33_s6  }
  0x24   : > { %p42_p13 = por %p41_p10, %p40_p12  ;;  %p2054_p0 = scmp.eq.s32.totalorder %s1784_s22, 1 }
  0x25   : > { %s204_s15 = sand.u32 1, %s1716_s20   ;;  %s1366_s16 = sshll.u32 %s1720_s21, 10 }
  0x26   : > { %p1838_p3 = por %p2054_p0, %p40_p12  ;;  %s1282_s17 = sshll.u32 %s204_s15, 6 }
  0x27   : > { %s1847_s29 = scalar_lea.hbm %s2040_s0, %s1366_s16  ;;  %s208_s28 = scalar_lea.vmem [#allocation2], %s1282_s17 }
  0x28   : > { %s2055_s14 = scalar_select %p1838_p3, 1, 0 }
  0x29   : > { %s215_s6 = sshll.u32 %s208_s28, 4  ;;  %p1849_p11 = pnand %p1417_p2, %p42_p13  ;;  %s1853_s6 = int_to_ptr.vmem [resolvable:$true] %s215_s6 }
  0x2a   : > { %s1855_s8 = scalar_lea.sflag [#allocation3], %s204_s15  ;;  %s1594_s9 = scalar_lea.hbm %s1847_s29, 1024 }
  0x2b   : > { %p1595_p5 = scmp.ne.s32.totalorder %s1847_s29, %s1594_s9  ;;  %p1596_p7 = pneg %p1849_p11 }
  0x2c   : > { %s1599_s12 = scalar_lea.hbm %s2040_s0, 2048  ;;  %p1600_p10 = scmp.lt.s32.totalorder %s1847_s29, %s2040_s0 }
  0x2d   : > { %p1597_p9 = pnand %p1596_p7, %p1595_p5  ;;  %p1601_p2 = scmp.lt.s32.totalorder %s1599_s12, %s1594_s9 }
  0x2f   : > { %p1598_p12 = pneg %p1597_p9  ;;  %p1602_p13 = por %p1601_p2, %p1600_p10 }
  0x31   : > { %p1603_p0 = pnand %p1602_p13, %p1598_p12 }
  0x33   : > { %1606 = shalt.err (!%p1603_p0)
}
  0x34   : > { %s1607_s15 = scalar_lea.vmem %s1853_s6, 1024  ;;  %s1725_s23 = smov [#allocation2]  }
  0x35   : > { %p1608_p1 = scmp.ne.s32.totalorder %s1853_s6, %s1607_s15  ;;  %s1612_s27 = sshll.u32 %s1725_s23, 4  ;;  %s1613_s27 = int_to_ptr.vmem [resolvable:$false] %s1612_s27 }
  0x36   : > { %s1614_s28 = scalar_lea.vmem %s1613_s27, 2048  ;;  %p1615_p9 = scmp.lt.s32.totalorder %s1853_s6, %s1613_s27 }
  0x37   : > { %p1610_p6 = pnand %p1608_p1, %p1596_p7  ;;  %p1616_p3 = scmp.lt.s32.totalorder %s1614_s28, %s1607_s15 }
  0x39   : > { %p1611_p5 = pneg %p1610_p6  ;;  %p1617_p4 = por %p1616_p3, %p1615_p9 }
  0x3b   : > { %p1618_p8 = pnand %p1617_p4, %p1611_p5 }
  0x3d   : > { %1621 = shalt.err (!%p1618_p8)
}
  0x3e   : > { %s1726_s9 = smov 256   ;;  %s1727_s10 = smov 16  }
  0x3f   : > { %1408 = dma.hbm_to_vmem [thread:$0]  (!%p1849_p11), %s1847_s29, 1024, %s1853_s6, %s1855_s8, %s1726_s9, %s1726_s9, %s1727_s10  }
  0x40   : > { %p2057_p1 = scmp.ne.s32.totalorder %s2052_s26, 0 }
  0x41   : > { %s1879_s11 = sand.u32 (!%p2057_p1), 1, %s1712_s19   ;;  %p2058_p4 = scmp.ne.s32.totalorder (!%p2057_p1), %s2050_s24, 0 }
  0x42   : > { %227 = sbr.rel (%p2057_p1) target bundleno = 883 (0x373), region = 36  ;;  %s1286_s12 = sshll.u32 (!%p2057_p1), %s1879_s11, 6 }
  0x43   : > { %s230_s16 = scalar_lea.sflag (!%p2057_p1), [#allocation3], %s1879_s11  ;;  %s233_s17 = scalar_lea.vmem (!%p2057_p1), [#allocation2], %s1286_s12 }
  0x47   : > { %1691 = dma.done.wait (%p2058_p4), %s230_s16, 1024  }
  0x48   : > { %1693 = vsyncadd (%p2058_p4), %s230_s16, 4294966272  ;;  %p2059_p6 = scmp.eq.s32.totalorder %s1784_s22, 0 }
  0x4a   : > { %1695 = dma.done.wait (%p2059_p6), [#allocation6], 8192   ;;  %p2060_p8 = pmov %p2059_p6 }
  0x4b   : > { %v1891_v0 = vld [vmem:[%s233_s17 + $0x20] sm:$0xff]  ;;  %v1893_v1 = vld [vmem:[%s233_s17 + $0x28] sm:$0xff]  ;;  %v1901_v5 = vld [vmem:[%s233_s17 + $0x30] sm:$0xff]  ;;  %v1728_v16 = vmov 0.0   ;;  %vm1729_vm0 = vmmov 0   ;;  %v309_v21 = vlaneseq  ;;  %vm320_vm1 = vcmask 130112  }
  0x4c   : > { %1697 = vsyncadd (%p2060_p8), [#allocation6], 4294959104  ;;  %v1895_v2 = vld [vmem:[%s233_s17] sm:$0xff]  ;;  %v282_v3 = vadd.f32 %v1893_v1, %v1891_v0  ;;  %v1899_v4 = vld [vmem:[%s233_s17 + $0x8] sm:$0xff]  ;;  %v299_v15 = vmax.f32 %v1891_v0, %v1893_v1  ;;  %1375 = vmatprep.subr.mxu0 %v1728_v16  ;;  %1386 = vmatprep.subr.mxu1 %v1728_v16  ;;  %vm327_vm2 = vcmask 195712   ;;  %vm334_vm3 = vcmask 261312  }
  0x4d   : > { %v1903_v6 = vld [vmem:[%s233_s17 + $0x38] sm:$0xff]  ;;  %v276_v7 = vadd.f32 %v1899_v4, %v1895_v2  ;;  %v1907_v8 = vld [vmem:[%s233_s17 + $0x10] sm:$0xff]  ;;  %v293_v13 = vmax.f32 %v1895_v2, %v1899_v4  ;;  %v364_v19 = vld [vmem:[%s2041_s1 + $0x8] sm:$0xff]  ;;  %1383 = vmatprep.mubr.msk.f32.mxu0 %vm1729_vm0, %v1728_v16  ;;  %1388 = vmatprep.mubr.msk.f32.mxu1 %vm1729_vm0, %v1728_v16  ;;  %v1943_v22 = vand.u32 127, %v309_v21  ;;  %v1947_v25 = vshrl.u32 %v309_v21, 7  ;;  %s260_s9 = scalar_lea.vmem [#allocation7], %s1879_s11 }
  0x4e   : > { %v1909_v9 = vld [vmem:[%s233_s17 + $0x18] sm:$0xff]  ;;  %283 = vadd.xlane.f32.xlu1 %v282_v3  ;;  %v285_v10 = vadd.f32 %v1903_v6, %v1901_v5  ;;  %v302_v14 = vmax.f32 %v1901_v5, %v1903_v6  ;;  %v365_v18 = vld [vmem:[%s2041_s1 + $0x10] sm:$0xff]  ;;  %v363_v20 = vld [vmem:[%s2041_s1] sm:$0xff]  ;;  %vm361_vm4 = vcmask 1040384   ;;  %vm367_vm5 = vcmask 261120   ;;  %s1361_s10 = sshll.u32 %s1784_s22, 4 }
  0x4f   : > { %277 = vadd.xlane.f32.xlu0 %v276_v7  ;;  %v279_v11 = vadd.f32 %v1909_v9, %v1907_v8  ;;  %v296_v12 = vmax.f32 %v1907_v8, %v1909_v9  ;;  %v366_v17 = vld [vmem:[%s2041_s1 + $0x18] sm:$0xff]  ;;  %v315_v24 = vadd.s32 4294967288, %v1943_v22  ;;  %v322_v27 = vadd.s32 4294967280, %v1943_v22  ;;  %v442_v58 = vld [vmem:[%s2042_s2] sm:$0x3]  ;;  %s1154_s17 = scalar_lea.hbm %s2044_s4, %s1361_s10  ;;  %s1156_s24 = sshll.u32 %s260_s9, 4  ;;  %s1157_s24 = int_to_ptr.vmem [resolvable:$true] %s1156_s24 }
  0x50   : > { %1376 = vmatpush3.msra.mxu0 %v366_v17  ;;  %v313_v30 = vsub.s32 %v1943_v22, %v1947_v25  ;;  %v329_v32 = vadd.s32 4294967272, %v1943_v22  ;;  %vm447_vm6 = vcmask 1041408   ;;  %v1466_v59 = vld [vmem:[#allocation5 + $0x70] ss:$8 sps:$4 sm:$0xff]   ;;  %v1468_v60 = vld [vmem:[#allocation5 + $0x74] ss:$8 sps:$4 sm:$0xff]  }
  0x51   : > { %1377 = vmatprep.subr.mxu0 %v1728_v16  ;;  %v318_v29 = vsub.s32 %v315_v24, %v1947_v25  ;;  %v325_v35 = vsub.s32 %v322_v27, %v1947_v25  ;;  %1387 = vmatpush3.msk.msra.mxu1 %vm447_vm6, %v442_v58  ;;  %v1472_v61 = vld [vmem:[#allocation5 + $0x60] ss:$8 sps:$4 sm:$0xff]   ;;  %v1474_v62 = vld [vmem:[#allocation5 + $0x64] ss:$8 sps:$4 sm:$0xff]   ;;  %v1478_v63 = vld [vmem:[#allocation5 + $0x50] ss:$8 sps:$4 sm:$0xff]  }
  0x52   : > { %286 = vadd.xlane.f32.xlu1 %v285_v10  ;;  %1378 = vmatpush3.msra.mxu0 %v365_v18  ;;  %v332_v40 = vsub.s32 %v329_v32, %v1947_v25  ;;  %v1480_v3 = vld [vmem:[#allocation5 + $0x54] ss:$8 sps:$4 sm:$0xff]   ;;  %v1484_v7 = vld [vmem:[#allocation5 + $0x40] ss:$8 sps:$4 sm:$0xff]   ;;  %v1486_v10 = vld [vmem:[#allocation5 + $0x44] ss:$8 sps:$4 sm:$0xff]  }
  0x53   : > { %280 = vadd.xlane.f32.xlu0 %v279_v11  ;;  %1379 = vmatprep.subr.mxu0 %v1728_v16  ;;  %v1490_v11 = vld [vmem:[#allocation5 + $0x30] ss:$8 sps:$4 sm:$0xff]   ;;  %v1504_v17 = vld [vmem:[#allocation5 + $0x14] ss:$8 sps:$4 sm:$0xff]   ;;  %v1508_v18 = vld [vmem:[#allocation5] ss:$8 sps:$4 sm:$0xff]  }
  0x54   : > { %1380 = vmatpush3.msra.mxu0 %v364_v19  ;;  %568 = vmatprep.subr.mxu1 %v1903_v6  ;;  %v1510_v19 = vld [vmem:[#allocation5 + $0x4] ss:$8 sps:$4 sm:$0xff]   ;;  %v1520_v24 = vld [vmem:[#allocation5 + $0xe0] ss:$8 sps:$4 sm:$0xff]   ;;  %v1526_v27 = vld [vmem:[#allocation5 + $0xd0] ss:$8 sps:$4 sm:$0xff]  }
  0x55   : > { %1381 = vmatprep.subr.mxu0 %v1728_v16  ;;  %v1540_v32 = vld [vmem:[#allocation5 + $0xb4] ss:$8 sps:$4 sm:$0xff]   ;;  %vm443_vm7 = vcmask 15360   ;;  %v1517_v58 = vld [vmem:[#allocation5 + $0x1d0] ss:$8 sps:$4 sm:$0xff]   ;;  %vm531_vm11 = vcmask 253952  }
  0x56   : > { %297 = vmax.xlane.f32.xlu1 %v296_v12  ;;  %1382 = vmatpush3.msra.mxu0 %v363_v20  ;;  %v1492_v12 = vld [vmem:[#allocation5 + $0x34] ss:$8 sps:$4 sm:$0xff]   ;;  %v1514_v20 = vld [vmem:[#allocation5 + $0xf0] ss:$8 sps:$4 sm:$0xff]   ;;  %s1139_s26 = scalar_lea.sflag [#allocation4], %s1879_s11  ;;  %s1622_s29 = scalar_lea.vmem %s1157_s24, 16 }
  0x57   : > { %294 = vmax.xlane.f32.xlu0 %v293_v13  ;;  %1021 = vmatprep.subr.bf16.mxu0 %v1468_v60  ;;  %v1496_v13 = vld [vmem:[#allocation5 + $0x20] ss:$8 sps:$4 sm:$0xff]   ;;  %v615_v60 = vmax.f32 %v1895_v2, %v1891_v0  ;;  %p1623_p3 = scmp.ne.s32.totalorder %s1157_s24, %s1622_s29  ;;  %p2061_p11 = scmp.ne.s32.totalorder %s2055_s14, 0 }
  0x58   : > { %s1730_s6 = smov [#allocation7]  }
  0x59   : > { %p1624_p7 = pnand %p1623_p3, %p2061_p11  ;;  %s1626_s7 = sshll.u32 %s1730_s6, 4  ;;  %s1627_s7 = int_to_ptr.vmem [resolvable:$false] %s1626_s7 }
  0x5a   : > { %303 = vmax.xlane.f32.xlu1 %v302_v14  ;;  %v1498_v14 = vld [vmem:[#allocation5 + $0x24] ss:$8 sps:$4 sm:$0xff]   ;;  %s1628_s8 = scalar_lea.vmem %s1627_s7, 32  ;;  %p1629_p10 = scmp.lt.s32.totalorder %s1157_s24, %s1627_s7 }
  0x5b   : > { %300 = vmax.xlane.f32.xlu0 %v299_v15  ;;  %v1502_v15 = vld [vmem:[#allocation5 + $0x10] ss:$8 sps:$4 sm:$0xff]   ;;  %p1625_p12 = pneg %p1624_p7  ;;  %p1630_p2 = scmp.lt.s32.totalorder %s1628_s8, %s1622_s29 }
  0x5d   : > { %p1631_p13 = por %p1630_p2, %p1629_p10 }
  0x5f   : > { %p1632_p0 = pnand %p1631_p13, %p1625_p12 }
  0xd7   : > { %v284_v23 = vpop.xlane.xlu1 %283 }
  0xd8   : > { %v278_v26 = vpop.xlane.xlu0 %277  ;;  %v291_v36 = vmul.f32 0.00390625, %v284_v23  ;;  %v1516_v23 = vld [vmem:[#allocation5 + $0xf4] ss:$8 sps:$4 sm:$0xff]  }
  0xd9   : > { %v289_v31 = vmul.f32 0.00390625, %v278_v26  ;;  %v1522_v26 = vld [vmem:[#allocation5 + $0xe4] ss:$8 sps:$4 sm:$0xff]  }
  0xda   : > { %v326_v46 = vrot.slane %v291_v36, %v325_v35 }
  0xdb   : > { %v287_v28 = vpop.xlane.xlu1 %286  ;;  %v314_v39 = vrot.slane %v289_v31, %v313_v30  ;;  %v1538_v31 = vld [vmem:[#allocation5 + $0xb0] ss:$8 sps:$4 sm:$0xff]  }
  0xdc   : > { %v281_v33 = vpop.xlane.xlu0 %280  ;;  %v292_v41 = vmul.f32 0.00390625, %v287_v28  ;;  %v1528_v28 = vld [vmem:[#allocation5 + $0xd4] ss:$8 sps:$4 sm:$0xff]  }
  0xdd   : > { %v290_v34 = vmul.f32 0.00390625, %v281_v33  ;;  %v535_v33 = vmul.u32 32, %v1947_v25 }
  0xde   : > { %v333_v48 = vrot.slane %v292_v41, %v332_v40  ;;  %v1463_v41 = vld [vmem:[#allocation5 + $0x160] ss:$8 sps:$4 sm:$0xff]  }
  0xdf   : > { %v319_v37 = vrot.slane %v290_v34, %v318_v29  ;;  %v298_v38 = vpop.xlane.xlu1 %297  ;;  %v537_v34 = vadd.s32 32, %v535_v33  ;;  %vm536_vm8 = vcmp.ge.s32.totalorder %v1943_v22, %v535_v33  ;;  %v1555_v33 = vld [vmem:[#allocation5 + $0x84] ss:$8 sps:$4 sm:$0xff]  }
  0xe0   : > { %v295_v42 = vpop.xlane.xlu0 %294  ;;  %v348_v44 = vrot.slane %v298_v38, %v318_v29  ;;  %v1532_v29 = vld [vmem:[#allocation5 + $0xc0] ss:$8 sps:$4 sm:$0xff]   ;;  %v1462_v38 = vld [vmem:[#allocation5 + $0x174] ss:$8 sps:$4 sm:$0xff]  }
  0xe1   : > { %v321_v43 = vsel %vm320_vm1, %v319_v37, %v314_v39  ;;  %v344_v45 = vrot.slane %v295_v42, %v313_v30  ;;  %v1534_v30 = vld [vmem:[#allocation5 + $0xc4] ss:$8 sps:$4 sm:$0xff]   ;;  %vm538_vm9 = vcmp.lt.s32.totalorder %v1943_v22, %v537_v34  ;;  %v1471_v42 = vld [vmem:[#allocation5 + $0x154] ss:$8 sps:$4 sm:$0xff]   ;;  %v1553_v34 = vld [vmem:[#allocation5 + $0x80] ss:$8 sps:$4 sm:$0xff]  }
  0xe2   : > { %v328_v52 = vsel %vm327_vm2, %v326_v46, %v321_v43  ;;  %vm539_vm10 = vmand %vm536_vm8, %vm538_vm9  ;;  %v1465_v22 = vld [vmem:[#allocation5 + $0x164] ss:$8 sps:$4 sm:$0xff]   ;;  %v1469_v43 = vld [vmem:[#allocation5 + $0x150] ss:$8 sps:$4 sm:$0xff]  }
  0xe3   : > { %v304_v47 = vpop.xlane.xlu1 %303  ;;  %v349_v53 = vsel %vm320_vm1, %v348_v44, %v344_v45  ;;  %v335_v56 = vsel %vm334_vm3, %v333_v48, %v328_v52  ;;  %v540_v39 = vsel %vm539_vm10, 0.03125, %v1728_v16  ;;  %v1477_v44 = vld [vmem:[#allocation5 + $0x144] ss:$8 sps:$4 sm:$0xff]   ;;  %v1475_v45 = vld [vmem:[#allocation5 + $0x140] ss:$8 sps:$4 sm:$0xff]  }
  0xe4   : > { %v301_v49 = vpop.xlane.xlu0 %300  ;;  %v358_v50 = vrot.slane %v304_v47, %v332_v40  ;;  %v1460_v40 = vld [vmem:[#allocation5 + $0x170] ss:$8 sps:$4 sm:$0xff]   ;;  %v1489_v47 = vld [vmem:[#allocation5 + $0x124] ss:$8 sps:$4 sm:$0xff]   ;;  %v1487_v48 = vld [vmem:[#allocation5 + $0x120] ss:$8 sps:$4 sm:$0xff]  }
  0xe5   : > { %v353_v51 = vrot.slane %v301_v49, %v325_v35  ;;  %v1481_v46 = vld [vmem:[#allocation5 + $0x130] ss:$8 sps:$4 sm:$0xff]   ;;  %v1495_v49 = vld [vmem:[#allocation5 + $0x114] ss:$8 sps:$4 sm:$0xff]   ;;  %v1499_v52 = vld [vmem:[#allocation5 + $0x100] ss:$8 sps:$4 sm:$0xff]  }
  0xe7   : > { %v354_v54 = vsel %vm327_vm2, %v353_v51, %v349_v53  ;;  %v1501_v51 = vld [vmem:[#allocation5 + $0x104] ss:$8 sps:$4 sm:$0xff]   ;;  %v1507_v53 = vld [vmem:[#allocation5 + $0x1f4] ss:$8 sps:$4 sm:$0xff]  }
  0xe8   : > { %v359_v55 = vsel %vm334_vm3, %v358_v50, %v354_v54  ;;  %v1493_v50 = vld [vmem:[#allocation5 + $0x110] ss:$8 sps:$4 sm:$0xff]  }
  0xe9   : > { %v362_v57 = vsel %vm361_vm4, %v335_v56, %v359_v55  ;;  %v1505_v54 = vld [vmem:[#allocation5 + $0x1f0] ss:$8 sps:$4 sm:$0xff]   ;;  %v1513_v55 = vld [vmem:[#allocation5 + $0x1e4] ss:$8 sps:$4 sm:$0xff]   ;;  %v1511_v56 = vld [vmem:[#allocation5 + $0x1e0] ss:$8 sps:$4 sm:$0xff]  }
  0xea   : > { %1384 = vmatmul.mubr.msk.f32.vlgmr.msra.gmra.mxu0 %vm367_vm5, %v362_v57  ;;  %v1519_v57 = vld [vmem:[#allocation5 + $0x1d4] ss:$8 sps:$4 sm:$0xff]  }
  0xeb   : > { %1022 = vmatpush1.bf16.msra.mxu0 %v1466_v59  ;;  %v1525_v59 = vld [vmem:[#allocation5 + $0x1c4] ss:$8 sps:$4 sm:$0xff]  }
  0xec   : > { %1023 = vmatprep.subr.bf16.mxu0 %v1474_v62  ;;  %v1523_v62 = vld [vmem:[#allocation5 + $0x1c0] ss:$8 sps:$4 sm:$0xff]  }
  0xef   : > { %1024 = vmatpush1.bf16.msra.mxu0 %v1472_v61  ;;  %v616_v61 = vmax.f32 %v1907_v8, %v1901_v5 }
  0xf0   : > { %1025 = vmatprep.subr.bf16.mxu0 %v1480_v3  ;;  %v624_v3 = vmax.f32 %v1899_v4, %v1893_v1 }
  0xf3   : > { %1026 = vmatpush1.bf16.msra.mxu0 %v1478_v63  ;;  %v1531_v63 = vld [vmem:[#allocation5 + $0x1b4] ss:$8 sps:$4 sm:$0xff]  }
  0xf4   : > { %1027 = vmatprep.subr.bf16.mxu0 %v1486_v10  ;;  %v617_v10 = vmax.f32 %v615_v60, %v616_v61 }
  0xf7   : > { %1028 = vmatpush1.bf16.msra.mxu0 %v1484_v7  ;;  %v625_v7 = vmax.f32 %v1909_v9, %v1903_v6 }
  0xf8   : > { %1029 = vmatprep.subr.bf16.mxu0 %v1492_v12  ;;  %v1537_v12 = vld [vmem:[#allocation5 + $0x1a4] ss:$8 sps:$4 sm:$0xff]  }
  0xfb   : > { %1030 = vmatpush1.bf16.msra.mxu0 %v1490_v11  ;;  %v1529_v11 = vld [vmem:[#allocation5 + $0x1b0] ss:$8 sps:$4 sm:$0xff]  }
  0xfc   : > { %1031 = vmatprep.subr.bf16.mxu0 %v1498_v14 }
  0xff   : > { %1032 = vmatpush1.bf16.msra.mxu0 %v1496_v13  ;;  %v626_v13 = vmax.f32 %v624_v3, %v625_v7 }
 0x100   : > { %1033 = vmatprep.subr.bf16.mxu0 %v1504_v17  ;;  %v1541_v17 = vld [vmem:[#allocation5 + $0x190] ss:$8 sps:$4 sm:$0xff]  }
 0x103   : > { %1034 = vmatpush1.bf16.msra.mxu0 %v1502_v15 }
 0x104   : > { %1035 = vmatprep.subr.bf16.mxu0 %v1510_v19  ;;  %v1544_v19 = vld [vmem:[#allocation5 + $0xa0] ss:$8 sps:$4 sm:$0xff]  }
 0x107   : > { %1036 = vmatpush1.bf16.msra.mxu0 %v1508_v18 }
 0x108   : > { %1037 = vmatprep.subr.bf16.mxu0 %v1516_v23  ;;  %v1549_v23 = vld [vmem:[#allocation5 + $0x184] ss:$8 sps:$4 sm:$0xff]  }
 0x10b   : > { %1038 = vmatpush2.bf16.msra.mxu0 %v1514_v20 }
 0x10c   : > { %1039 = vmatprep.subr.bf16.mxu0 %v1522_v26  ;;  %v1547_v26 = vld [vmem:[#allocation5 + $0x180] ss:$8 sps:$4 sm:$0xff]  }
 0x10f   : > { %1040 = vmatpush2.bf16.msra.mxu0 %v1520_v24 }
 0x110   : > { %1041 = vmatprep.subr.bf16.mxu0 %v1528_v28  ;;  %v1552_v28 = vld [vmem:[#allocation5 + $0x94] ss:$8 sps:$4 sm:$0xff]  }
 0x113   : > { %1042 = vmatpush2.bf16.msra.mxu0 %v1526_v27 }
 0x114   : > { %1043 = vmatprep.subr.bf16.mxu0 %v1534_v30  ;;  %v1550_v30 = vld [vmem:[#allocation5 + $0x90] ss:$8 sps:$4 sm:$0xff]  }
 0x117   : > { %1044 = vmatpush2.bf16.msra.mxu0 %v1532_v29 }
 0x118   : > { %1045 = vmatprep.subr.bf16.mxu0 %v1540_v32 }
 0x11b   : > { %1046 = vmatpush2.bf16.msra.mxu0 %v1538_v31 }
 0x1aa   : > { %v437_v35 = vpop.f32.mrf.mxu0 }
 0x1ab   : > { %v441_v36 = vmax.f32 %v437_v35, 0.0 }
 0x1ac   : > { %v1385_v37 = vpop.f32.mrf.mxu0 }
 0x1ad   : > { %1389 = vmatmul.mubr.msk.f32.vlgmr.msra.gmra.mxu1 %vm443_vm7, %v441_v36 }
 0x1ae   : > { %569 = vmatpush1.msra.mxu1 %v1901_v5  ;;  %608 = vmatprep.mubr.f32.mxu1 %v1728_v16  ;;  %v1483_v16 = vld [vmem:[#allocation5 + $0x134] ss:$8 sps:$4 sm:$0xff]   ;;  %v627_v5 = vrot.slane %v626_v13, 4 }
 0x1af   : > { %570 = vmatprep.subr.mxu1 %v1893_v1 }
 0x1b0   : > { %571 = vmatpush1.msra.mxu1 %v1891_v0  ;;  %v618_v0 = vrot.slane %v617_v10, 4  ;;  %v628_v14 = vmax.f32 %v626_v13, %v627_v5 }
 0x1b1   : > { %572 = vmatprep.subr.mxu1 %v1909_v9  ;;  %v1546_v9 = vld [vmem:[#allocation5 + $0xa4] ss:$8 sps:$4 sm:$0xff]  }
 0x1b2   : > { %573 = vmatpush1.msra.mxu1 %v1907_v8  ;;  %v1543_v8 = vld [vmem:[#allocation5 + $0x194] ss:$8 sps:$4 sm:$0xff]   ;;  %v619_v15 = vmax.f32 %v617_v10, %v618_v0  ;;  %v629_v1 = vrot.slane %v628_v14, 2  ;;  %1047 = vmatprep.subr.bf16.mxu0 %v1546_v9 }
 0x1b3   : > { %574 = vmatprep.subr.mxu1 %v1899_v4  ;;  %1048 = vmatpush2.bf16.msra.mxu0 %v1544_v19 }
 0x1b4   : > { %575 = vmatpush1.msra.mxu1 %v1895_v2  ;;  %v1535_v2 = vld [vmem:[#allocation5 + $0x1a0] ss:$8 sps:$4 sm:$0xff]   ;;  %v620_v4 = vrot.slane %v619_v15, 2  ;;  %v630_v6 = vmax.f32 %v628_v14, %v629_v1  ;;  %1049 = vmatprep.subr.bf16.mxu0 %v1552_v28 }
 0x1b5   : > { %1293 = vmatmul.mubr.msk.f32.vlgmr.msra.gmra.mxu1 %vm367_vm5, %v540_v39  ;;  %1062 = vmatprep.subr.bf16.mxu1 %v1462_v38 }
 0x1b6   : > { %1063 = vmatpush1.bf16.msra.mxu1 %v1460_v40  ;;  %v621_v18 = vmax.f32 %v619_v15, %v620_v4  ;;  %v631_v20 = vrot.slane %v630_v6, 1 }
 0x1b7   : > { %1064 = vmatprep.subr.bf16.mxu1 %v1465_v22  ;;  %1050 = vmatpush2.bf16.msra.mxu0 %v1550_v30 }
 0x1b8   : > { %v622_v24 = vrot.slane %v621_v18, 1  ;;  %v632_v27 = vmax.f32 %v630_v6, %v631_v20  ;;  %1051 = vmatprep.subr.bf16.mxu0 %v1555_v33 }
 0x1ba   : > { %1065 = vmatpush1.bf16.msra.mxu1 %v1463_v41  ;;  %v623_v29 = vmax.f32 %v621_v18, %v622_v24  ;;  %v636_v31 = vpack.c.bf16 %v632_v27, %v632_v27 }
 0x1bb   : > { %1066 = vmatprep.subr.bf16.mxu1 %v1471_v42  ;;  %1052 = vmatpush2.bf16.msra.mxu0 %v1553_v34 }
 0x1bc   : > { %v635_v32 = vpack.c.bf16 %v623_v29, %v623_v29  ;;  %1094 = vmatprep.mubr.bf16.mxu1 %v636_v31 }
 0x1be   : > { %1067 = vmatpush1.bf16.msra.mxu1 %v1469_v43 }
 0x1bf   : > { %1068 = vmatprep.subr.bf16.mxu1 %v1477_v44 }
 0x1c2   : > { %1069 = vmatpush1.bf16.msra.mxu1 %v1475_v45 }
 0x1c3   : > { %1070 = vmatprep.subr.bf16.mxu1 %v1483_v16 }
 0x1c6   : > { %1071 = vmatpush1.bf16.msra.mxu1 %v1481_v46 }
 0x1c7   : > { %1072 = vmatprep.subr.bf16.mxu1 %v1489_v47 }
 0x1ca   : > { %1073 = vmatpush1.bf16.msra.mxu1 %v1487_v48 }
 0x1cb   : > { %1074 = vmatprep.subr.bf16.mxu1 %v1495_v49 }
 0x1ce   : > { %1075 = vmatpush1.bf16.msra.mxu1 %v1493_v50 }
 0x1cf   : > { %1076 = vmatprep.subr.bf16.mxu1 %v1501_v51 }
 0x1d2   : > { %1077 = vmatpush1.bf16.msra.mxu1 %v1499_v52 }
 0x1d3   : > { %1078 = vmatprep.subr.bf16.mxu1 %v1507_v53 }
 0x1d6   : > { %1079 = vmatpush2.bf16.msra.mxu1 %v1505_v54 }
 0x1d7   : > { %1080 = vmatprep.subr.bf16.mxu1 %v1513_v55 }
 0x1da   : > { %1081 = vmatpush2.bf16.msra.mxu1 %v1511_v56 }
 0x1db   : > { %1082 = vmatprep.subr.bf16.mxu1 %v1519_v57 }
 0x1de   : > { %1083 = vmatpush2.bf16.msra.mxu1 %v1517_v58 }
 0x1df   : > { %1084 = vmatprep.subr.bf16.mxu1 %v1525_v59 }
 0x1e2   : > { %1085 = vmatpush2.bf16.msra.mxu1 %v1523_v62 }
 0x1e3   : > { %1086 = vmatprep.subr.bf16.mxu1 %v1531_v63 }
 0x1e6   : > { %1087 = vmatpush2.bf16.msra.mxu1 %v1529_v11 }
 0x1e7   : > { %1088 = vmatprep.subr.bf16.mxu1 %v1537_v12 }
 0x1ea   : > { %1089 = vmatpush2.bf16.msra.mxu1 %v1535_v2 }
 0x1eb   : > { %1090 = vmatprep.subr.bf16.mxu1 %v1543_v8 }
 0x1ee   : > { %1091 = vmatpush2.bf16.msra.mxu1 %v1541_v17 }
 0x1ef   : > { %1092 = vmatprep.subr.bf16.mxu1 %v1549_v23 }
 0x1f2   : > { %1093 = vmatpush2.bf16.msra.mxu1 %v1547_v26 }
 0x1f5   : > { %1095 = vmatmul.mubr.bf16.vlgmr.msra.gmra.mxu1 %v635_v32 }
 0x26d   : > { %v517_v35 = vpop.f32.mrf.mxu1 }
 0x26e   : > { %v522_v36 = vrot.slane %v517_v35, 1 }
 0x26f   : > { %v1390_v37 = vpop.f32.mrf.mxu1 }
 0x270   : > { %v524_v38 = vadd.f32 %v522_v36, %v517_v35 }
 0x272   : > { %v1292_v39 = vmul.f32 -1.442695, %v524_v38 }
 0x274   : > { %1556 = vpow2.f32 %v1292_v39 }
 0x275   : > { %v610_v40 = vpop.f32.mrf.mxu1 }
 0x276   : > { %v633_v42 = vpack.c.bf16 %v610_v40, %v610_v40 }
 0x277   : > { %v612_v22 = vpop.f32.mrf.mxu1 }
 0x278   : > { %v634_v41 = vpack.c.bf16 %v612_v22, %v612_v22 }
 0x27a   : > { %1053 = vmatprep.mubr.bf16.mxu0 %v634_v41 }
 0x27b   : > { %1054 = vmatmul.mubr.bf16.vlgmr.msra.gmra.mxu0 %v633_v42 }
 0x281   : > { %v1557_v43 = vpop.eup %1556 }
 0x282   : > { %v528_v44 = vadd.f32 1.0, %v1557_v43 }
 0x284   : > { %1558 = vrcp.f32 %v528_v44 }
 0x291   : > { %v1559_v45 = vpop.eup %1558 }
 0x292   : > { %532 = vst.msk [vmem:[%s260_s9] sm:$0x1] %vm531_vm11, %v1559_v45 }
 0x2b5   : > { %v1096_v16 = vpop.f32.mrf.mxu1 }
 0x2b7   : > { %v1098_v46 = vpop.f32.mrf.mxu1 }
 0x2b9   : > { %v1100_v47 = vpop.f32.mrf.mxu1 }
 0x2bb   : > { %v1101_v48 = vpop.f32.mrf.mxu1 }
 0x2bc   : > { %1635 = shalt.err (!%p1632_p0)
}
 0x2bd   : > { %s1636_s15 = scalar_lea.hbm %s1154_s17, 16  ;;  %s1640_s28 = scalar_lea.hbm %s2044_s4, 32 }
 0x2be   : > { %p1637_p5 = scmp.ne.s32.totalorder %s1154_s17, %s1636_s15  ;;  %p1641_p4 = scmp.lt.s32.totalorder %s1154_s17, %s2044_s4 }
 0x2bf   : > { %p1642_p6 = scmp.lt.s32.totalorder %s1640_s28, %s1636_s15 }
 0x2c0   : > { %p1638_p9 = pnand %p1637_p5, %p2061_p11 }
 0x2c1   : > { %p1643_p8 = por %p1642_p6, %p1641_p4 }
 0x2c2   : > { %p1639_p1 = pneg %p1638_p9 }
 0x2c4   : > { %p1644_p3 = pnand %p1643_p8, %p1639_p1 }
 0x2c6   : > { %1647 = shalt.err (!%p1644_p3)
}
 0x2c7   : > { %1397 = dma.vmem_to_hbm [thread:$0]  (%p2061_p11), %s1157_s24, 16, %s1154_s17, %s1139_s26   ;;  %v1731_v61 = vmov 1966171168   ;;  %vm1135_vm12 = vcmp.lt.s32.totalorder %v309_v21, 256 }
 0x2c8   : > { %v1119_v62 = vunpack.c.l.s4 %v1731_v61  ;;  %s1288_s12 = sshll.u32 %s1879_s11, 1  ;;  %s1367_s16 = sshll.u32 %s1784_s22, 5 }
 0x2c9   : > { %s267_s17 = scalar_lea.vmem [#allocation8], %s1288_s12  ;;  %s1168_s6 = scalar_lea.hbm %s2045_s5, %s1367_s16 }
 0x2ca   : > { %v1120_v63 = vunpack.c.0.s8 %v1119_v62  ;;  %s1170_s24 = sshll.u32 %s267_s17, 4  ;;  %s1143_s7 = scalar_lea.sflag [#allocation9], %s1879_s11  ;;  %s1171_s24 = int_to_ptr.vmem [resolvable:$true] %s1170_s24 }
 0x2cb   : > { %s1648_s8 = scalar_lea.vmem %s1171_s24, 32  ;;  %s1732_s15 = smov [#allocation8]  }
 0x2cc   : > { %v1123_v7 = vsub.s32 %v1120_v63, %v1947_v25  ;;  %p1649_p7 = scmp.ne.s32.totalorder %s1171_s24, %s1648_s8  ;;  %s1652_s22 = sshll.u32 %s1732_s15, 4  ;;  %s1653_s22 = int_to_ptr.vmem [resolvable:$false] %s1652_s22 }
 0x2cd   : > { %s1654_s23 = scalar_lea.vmem %s1653_s22, 64  ;;  %p1655_p2 = scmp.lt.s32.totalorder %s1171_s24, %s1653_s22 }
 0x2ce   : > { %p1650_p12 = pnand %p1649_p7, %p2061_p11  ;;  %p1656_p13 = scmp.lt.s32.totalorder %s1654_s23, %s1648_s8 }
 0x2d0   : > { %p1651_p10 = pneg %p1650_p12  ;;  %p1657_p0 = por %p1656_p13, %p1655_p2 }
 0x2d2   : > { %p1658_p5 = pnand %p1657_p0, %p1651_p10 }
 0x33b   : > { %v1055_v49 = vpop.f32.mrf.mxu0 }
 0x33c   : > { %v1097_v50 = vadd.f32 %v1096_v16, %v1055_v49 }
 0x33d   : > { %v1057_v51 = vpop.f32.mrf.mxu0 }
 0x33e   : > { %v1358_v52 = vmul.f32 -1.442695, %v1097_v50  ;;  %v1099_v53 = vadd.f32 %v1098_v46, %v1057_v51 }
 0x33f   : > { %v1059_v54 = vpop.f32.mrf.mxu0 }
 0x340   : > { %1560 = vpow2.f32 %v1358_v52  ;;  %v1359_v55 = vmul.f32 -1.442695, %v1099_v53 }
 0x341   : > { %v1060_v56 = vpop.f32.mrf.mxu0 }
 0x342   : > { %1562 = vpow2.f32 %v1359_v55 }
 0x34d   : > { %v1561_v57 = vpop.eup %1560 }
 0x34e   : > { %v1109_v58 = vadd.f32 1.0, %v1561_v57 }
 0x34f   : > { %v1563_v59 = vpop.eup %1562 }
 0x350   : > { %v1110_v60 = vadd.f32 1.0, %v1563_v59  ;;  %1564 = vrcp.f32 %v1109_v58 }
 0x352   : > { %1566 = vrcp.f32 %v1110_v60 }
 0x35d   : > { %v1565_v3 = vpop.eup %1564 }
 0x35f   : > { %v1567_v10 = vpop.eup %1566 }
 0x360   : > { %v1117_v11 = vcombine.low %v1565_v3, %v1567_v10 }
 0x362   : > { %v1124_v12 = vrot.slane %v1117_v11, %v1123_v7 }
 0x364   : > { %v1131_v13 = vrot.slane %v1124_v12, %v1123_v7 }
 0x366   : > { %1137 = vst.msk [vmem:[%s267_s17] sm:$0x3] %vm1135_vm12, %v1131_v13 }
 0x367   : > { %1661 = shalt.err (!%p1658_p5)
}
 0x368   : > { %s1662_s27 = scalar_lea.hbm %s1168_s6, 32  ;;  %s1666_s9 = scalar_lea.hbm %s2045_s5, 64 }
 0x369   : > { %p1663_p9 = scmp.ne.s32.totalorder %s1168_s6, %s1662_s27  ;;  %p1667_p6 = scmp.lt.s32.totalorder %s1168_s6, %s2045_s5 }
 0x36a   : > { %p1668_p8 = scmp.lt.s32.totalorder %s1666_s9, %s1662_s27 }
 0x36b   : > { %p1664_p1 = pnand %p1663_p9, %p2061_p11 }
 0x36c   : > { %p1669_p3 = por %p1668_p8, %p1667_p6 }
 0x36d   : > { %p1665_p4 = pneg %p1664_p1 }
 0x36f   : > { %p1670_p7 = pnand %p1669_p3, %p1665_p4 }
 0x371   : > { %1673 = shalt.err (!%p1670_p7)
}
 0x372   : > { %1398 = dma.vmem_to_hbm [thread:$0]  (%p2061_p11), %s1171_s24, 32, %s1168_s6, %s1143_s7  }
 0x373 PF: > { %s1182_s16 = sand.u32 1, %s1708_s18   ;;  %p2062_p12 = scmp.ne.s32.totalorder %s2051_s25, 0 }
 0x374   : > { %p2063_p10 = scmp.ge.s32.totalorder %s1720_s21, 2  ;;  %s1183_s17 = scalar_lea.sflag [#allocation4], %s1182_s16 }
 0x376   : > { %p1410_p2 = pnand %p2063_p10, %p2062_p12 }
 0x378   : > { %p1411_p13 = pneg %p1410_p2 }
 0x37a   : > { %1699 = dma.done.wait (%p1411_p13), %s1183_s17, 16  }
 0x37b   : > { %1701 = vsyncadd (%p1411_p13), %s1183_s17, 4294967280  ;;  %s1191_s26 = scalar_lea.sflag [#allocation9], %s1182_s16 }
 0x37c   : > { %1703 = dma.done.wait (%p1411_p13), %s1191_s26, 32  }
 0x37d   : > { %1705 = vsyncadd (%p1411_p13), %s1191_s26, 4294967264  ;;  %p23_p11 = scmp.ge.s32.totalorder %s1817_s30, 4   ;;  %s2064_s18 = smov %s1712_s19 }
 0x37e   : > { %s2065_s19 = smov %s1716_s20  ;;  %s2066_s20 = smov %s1834_s13 }
 0x37f   : > { %s2067_s21 = smov %s1817_s30  ;;  %25 = sbr.rel (!%p23_p11) target bundleno = 8 (0x8), region = 102 }
 0x384   :  { %1196 = vsyncpa [#allocation3], 1 }
 0x385   :  { %1198 = vsyncpa [#allocation3 + $0x1], 1 }
 0x386   :  { %1199 = vsyncpa [#allocation6], 1 }
 0x387   :  { %1200 = vsyncpa [#allocation4], 1 }
 0x388   :  { %1202 = vsyncpa [#allocation4 + $0x1], 1 }
 0x389   :  { %1203 = vsyncpa [#allocation9], 1 }
 0x38a   :  { %1205 = vsyncpa [#allocation9 + $0x1], 1 }

</bundles_post_ra>
